<compile_context>
chip_gen: v7x
topology: tpu7x:2x2x1
jax: 0.10.0
libtpu: 0.0.40
codegen_flags: <defaults>
</compile_context>

<pallas_src>
import jax
import jax.numpy as jnp
from jax.experimental import pallas as pl
from jax.experimental.pallas import tpu as pltpu


def highway_kernel(x_ref, w_ref, b_ref, o_ref):
    D = x_ref.shape[-1]
    x = x_ref[...]                                               # (tm, D)
    # Single fused matmul: [tm, D] @ [D, 2D] -> (tm, 2D); f32 accumulation.
    hw = jnp.dot(x, w_ref[...], preferred_element_type=jnp.float32)
    h = jnp.maximum(hw[:, :D], 0.0)                              # H = ReLU
    t = jax.nn.sigmoid(hw[:, D:] + b_ref[...])                   # transform gate
    xf = x.astype(jnp.float32)
    o_ref[...] = (xf + t * (h - xf)).astype(o_ref.dtype)         # = h*t + x*(1-t)


def _round_up(a, b):
    return (a + b - 1) // b * b


def highway(x, wh_t, wt_t, bt, *, tm=512):
    """x: [M, D]; wh_t/wt_t: [D, D] (pre-transposed, i.e. y = x @ W); bt: [D]."""
    M, D = x.shape

    # Pad the feature dim to a lane multiple so in-kernel result slices are
    # tile-aligned (free). Padded weight/bias columns are zero; padded output
    # columns are sliced off below.
    D_pad = _round_up(D, 128)
    if D_pad != D:
        wh_t = jnp.pad(wh_t, ((0, D_pad - D), (0, D_pad - D)))
        wt_t = jnp.pad(wt_t, ((0, D_pad - D), (0, D_pad - D)))
        bt = jnp.pad(bt.reshape(-1), (0, D_pad - D))
        x = jnp.pad(x, ((0, 0), (0, D_pad - D)))
    w_fused = jnp.concatenate([wh_t, wt_t], axis=1)              # [D_pad, 2*D_pad]
    bt = bt.reshape(1, D_pad)

    # Row tile: as large as requested, but keep >= 2 grid steps so both
    # TensorCores on v7x get work; round to the sublane unit (8).
    tm_eff = max(8, min(tm, _round_up(pl.cdiv(M, 2), 8)))
    M_pad = _round_up(M, tm_eff)
    x_in = jnp.pad(x, ((0, M_pad - M), (0, 0))) if M_pad != M else x
    grid_m = M_pad // tm_eff

    x_bytes = jnp.dtype(x.dtype).itemsize
    w_bytes = jnp.dtype(w_fused.dtype).itemsize
    cost = pl.CostEstimate(
        flops=2 * M_pad * D_pad * (2 * D_pad) + 5 * M_pad * D_pad,
        transcendentals=M_pad * D_pad,
        bytes_accessed=(2 * M_pad * D_pad * x_bytes
                        + 2 * D_pad * D_pad * w_bytes + D_pad * w_bytes),
    )

    out = pl.pallas_call(
        highway_kernel,
        out_shape=jax.ShapeDtypeStruct((M_pad, D_pad), x.dtype),
        grid_spec=pltpu.PrefetchScalarGridSpec(
            num_scalar_prefetch=0,
            grid=(grid_m,),
            in_specs=[
                pl.BlockSpec((tm_eff, D_pad), lambda i: (i, 0)),     # x row tile
                pl.BlockSpec((D_pad, 2 * D_pad), lambda i: (0, 0)),  # fused [Wh|Wt]^T (resident)
                pl.BlockSpec((1, D_pad), lambda i: (0, 0)),          # bias row (resident)
            ],
            out_specs=pl.BlockSpec((tm_eff, D_pad), lambda i: (i, 0)),
        ),
        compiler_params=pltpu.CompilerParams(
            dimension_semantics=("parallel",)),
        cost_estimate=cost,
    )(x_in, w_fused, bt)

    if M_pad != M or D_pad != D:
        out = out[:M, :D]
    return out


if __name__ == "__main__":
    B, S, D = 2, 8, 128            # batch, seq, hidden size (module `size`)
    key = jax.random.PRNGKey(0)
    kx, kwh, kwt, kb = jax.random.split(key, 4)

    x = jax.random.normal(kx, (B, S, D), dtype=jnp.float32)
    # PyTorch nn.Linear weights are [out, in]; transpose to [in, out] for x @ W.
    wh = jax.random.normal(kwh, (D, D), dtype=jnp.float32) * 0.05
    wt = jax.random.normal(kwt, (D, D), dtype=jnp.float32) * 0.05
    bt = jax.random.normal(kb, (D,), dtype=jnp.float32) * 0.05

    x2d = x.reshape(B * S, D)
    y2d = highway(x2d, wh.T, wt.T, bt)
    y = y2d.reshape(B, S, D)
    jax.block_until_ready(y)

    # Pure-JAX reference check
    t_ref = jax.nn.sigmoid(x2d @ wt.T + bt)
    h_ref = jnp.maximum(x2d @ wh.T, 0.0)
    y_ref = (h_ref * t_ref + x2d * (1.0 - t_ref)).reshape(B, S, D)
    assert jnp.allclose(y, y_ref, atol=1e-5, rtol=1e-5)

    print("KERNEL_OK")
</pallas_src>

<mosaic_0001>
module attributes {stable_mosaic.version = 11 : i64} {
  func.func @highway_kernel(%arg0: i32, %arg1: memref<8x128xf32, #tpu.memory_space<vmem>>, %arg2: memref<128x256xf32, #tpu.memory_space<vmem>>, %arg3: memref<1x128xf32, #tpu.memory_space<vmem>>, %arg4: memref<8x128xf32, #tpu.memory_space<vmem>>) attributes {dimension_semantics = [#tpu.dimension_semantics<parallel>], iteration_bounds = array<i64: 2>, scalar_prefetch = 0 : i64, scratch_operands = 0 : i64, tpu.core_type = #tpu.core_type<tc>, window_params = [{transform_indices = @transform_0, window_bounds = array<i64: 8, 128>}, {pipeline_mode = #tpu.pipeline_mode<synchronous>, transform_indices = @transform_1, window_bounds = array<i64: 128, 256>}, {pipeline_mode = #tpu.pipeline_mode<synchronous>, transform_indices = @transform_2, window_bounds = array<i64: 1, 128>}, {transform_indices = @transform_3, window_bounds = array<i64: 8, 128>}]} {
    %c0 = arith.constant 0 : index
    %c0_0 = arith.constant 0 : index
    %0 = vector.load %arg1[%c0, %c0_0] : memref<8x128xf32, #tpu.memory_space<vmem>>, vector<8x128xf32>
    %c0_1 = arith.constant 0 : index
    %c0_2 = arith.constant 0 : index
    %1 = vector.load %arg2[%c0_1, %c0_2] : memref<128x256xf32, #tpu.memory_space<vmem>>, vector<128x256xf32>
    %cst = arith.constant dense<0.000000e+00> : vector<8x256xf32>
    %2 = tpu.matmul %0, %1, %cst {dimension_numbers = #tpu.dot_dimension_numbers<[1], [0], [0], [1], [0, 0, 1, 1], [], []>} : vector<8x128xf32>, vector<128x256xf32>, vector<8x256xf32> -> vector<8x256xf32>
    %3 = vector.extract_strided_slice %2 {offsets = [0, 0], sizes = [8, 128], strides = [1, 1]} : vector<8x256xf32> to vector<8x128xf32>
    %cst_3 = arith.constant 0.000000e+00 : f32
    %4 = vector.broadcast %cst_3 : f32 to vector<8x128xf32>
    %5 = arith.maximumf %3, %4 : vector<8x128xf32>
    %6 = vector.extract_strided_slice %2 {offsets = [0, 128], sizes = [8, 128], strides = [1, 1]} : vector<8x256xf32> to vector<8x128xf32>
    %c0_4 = arith.constant 0 : index
    %c0_5 = arith.constant 0 : index
    %7 = vector.load %arg3[%c0_4, %c0_5] : memref<1x128xf32, #tpu.memory_space<vmem>>, vector<1x128xf32>
    %8 = vector.broadcast %7 : vector<1x128xf32> to vector<8x128xf32>
    %9 = arith.addf %6, %8 : vector<8x128xf32>
    %10 = arith.negf %9 : vector<8x128xf32>
    %11 = math.exp %10 : vector<8x128xf32>
    %cst_6 = arith.constant 1.000000e+00 : f32
    %12 = vector.broadcast %cst_6 : f32 to vector<8x128xf32>
    %13 = arith.addf %12, %11 : vector<8x128xf32>
    %14 = arith.divf %12, %13 : vector<8x128xf32>
    %15 = arith.subf %5, %0 : vector<8x128xf32>
    %16 = arith.mulf %14, %15 : vector<8x128xf32>
    %17 = arith.addf %0, %16 : vector<8x128xf32>
    %c0_7 = arith.constant 0 : index
    %c0_8 = arith.constant 0 : index
    %18 = vector.load %arg4[%c0_7, %c0_8] : memref<8x128xf32, #tpu.memory_space<vmem>>, vector<8x128xf32>
    tpu.vector_store %arg4[%c0_7, %c0_8], %17 {strides = array<i32>} : memref<8x128xf32, #tpu.memory_space<vmem>>, vector<8x128xf32>,
    return
  }
  func.func @transform_0(%arg0: i32) -> (i32, i32) {
    %c0_i32 = arith.constant 0 : i32
    %c0_i32_0 = arith.constant 0 : i32
    return %arg0, %c0_i32 : i32, i32
  }
  func.func @transform_1(%arg0: i32) -> (i32, i32) {
    %c0_i32 = arith.constant 0 : i32
    %c0_i32_0 = arith.constant 0 : i32
    %c0_i32_1 = arith.constant 0 : i32
    return %c0_i32, %c0_i32_0 : i32, i32
  }
  func.func @transform_2(%arg0: i32) -> (i32, i32) {
    %c0_i32 = arith.constant 0 : i32
    %c0_i32_0 = arith.constant 0 : i32
    %c0_i32_1 = arith.constant 0 : i32
    return %c0_i32, %c0_i32_0 : i32, i32
  }
  func.func @transform_3(%arg0: i32) -> (i32, i32) {
    %c0_i32 = arith.constant 0 : i32
    %c0_i32_0 = arith.constant 0 : i32
    return %arg0, %c0_i32 : i32, i32
  }
}

</mosaic_0001>

<bundles_post_ra>
// kernel: tpu_custom_call.1
= control target key start
LH: loop header
LB: loop body
LE: loop exit
PB: predicated region body
PF: predicated region fallthrough
CT: control target
= control target key end

     0   :  { %8 = vsyncpa [#allocation3], 0  ;;  %s892_s0 = inlined_call_operand.hbm [shape: f32[16,128], index: 0, kind: input, shape index: {}]   ;;  %s893_s1 = inlined_call_operand.hbm [shape: f32[128,256], index: 1, kind: input, shape index: {}]   ;;  %s894_s2 = inlined_call_operand.vmem [shape: f32[1,128], index: 2, kind: input, shape index: {}]   ;;  %s895_s3 = inlined_call_operand.hbm [shape: f32[16,128], index: 3, kind: output, shape index: {}]  }
   0x1   :  { %10 = vsyncpa [#allocation3 + $0x1], 0 }
   0x2   :  { %11 = vsyncpa [#allocation6], 0 }
   0x3   :  { %12 = vsyncpa [#allocation4], 0 }
   0x4   :  { %14 = vsyncpa [#allocation4 + $0x1], 0  ;;  %s686_s12 = smov 0   ;;  %s688_s13 = smov 0  }
   0x5   :  { %s690_s14 = smov 0   ;;  %s692_s15 = smov 0  }
   0x6 LB: > { %s707_s16 = sadd.s32 4294967295, %s658_s15   ;;  %s418_s17 = sadd.s32 4294967294, %s658_s15   ;;  %s658_s15 = sphi %s692_s15, %s915_s15   ;;  %s654_s14 = sphi %s690_s14, %s914_s14   ;;  %s650_s13 = sphi %s688_s13, %s913_s13   ;;  %s646_s12 = sphi %s686_s12, %s912_s12  }
   0x7   : > { %p40_p0 = scmp.ne.s32.totalorder %s650_s13, %s646_s12  ;;  %p896_p1 = scmp.eq.s32.totalorder %s707_s16, 0 }
   0x8   : > { %p112_p3 = scmp.eq.s32.totalorder %s418_s17, 1  ;;  %p419_p5 = scmp.ge.s32.totalorder %s658_s15, 1 }
   0x9   : > { %p716_p4 = por %p896_p1, %p40_p0  ;;  %p119_p7 = scmp.lt.s32.totalorder %s658_s15, 3 }
   0xa   : > { %p721_p6 = por %p112_p3, %p40_p0  ;;  %s660_s21 = smov [#allocation5]  }
   0xb   : > { %s899_s18 = scalar_select %p716_p4, 1, 0 }
   0xc   : > { %s900_s19 = scalar_select %p721_p6, 1, 0 }
   0xd   : > { %p726_p8 = pnand %p419_p5, %p119_p7  ;;  %s131_s22 = sshll.u32 %s660_s21, 4  ;;  %s730_s22 = int_to_ptr.vmem [resolvable:$true] %s131_s22 }
   0xe   : > { %s742_s24 = sadd.s32 1, %s658_s15   ;;  %s27_s25 = sadd.s32 1, %s654_s14 }
   0xf   : > { %s901_s20 = scalar_select %p726_p8, 1, 0 }
  0x10   : > { %p474_p9 = pneg %p726_p8  ;;  %s24_s26 = ssub.s32 %s658_s15, %s742_s24 }
  0x11   : > { %s530_s29 = scalar_lea.hbm %s893_s1, 4096 }
  0x12   : > { %p737_p11 = pnand %p474_p9, %p896_p1  ;;  %p531_p12 = scmp.ne.s32.totalorder %s893_s1, %s530_s29 }
  0x13   : > { %p537_p5 = scmp.lt.u32.totalorder %s530_s29, %s893_s1 }
  0x14   : > { %p532_p13 = pneg %p737_p11 }
  0x16   : > { %p533_p0 = pnand %p532_p13, %p531_p12 }
  0x18   : > { %p534_p3 = pneg %p533_p0 }
  0x1a   : > { %p539_p7 = pnand %p537_p5, %p534_p3 }
  0x1c   : > { %542 = shalt.err (!%p539_p7)
}
  0x1d   : > { %s543_s7 = scalar_lea.vmem %s730_s22, 4096  ;;  %p551_p2 = scmp.lt.s32.totalorder %s730_s22, %s730_s22 }
  0x1e   : > { %p544_p9 = scmp.ne.s32.totalorder %s730_s22, %s543_s7  ;;  %p552_p6 = scmp.lt.s32.totalorder %s543_s7, %s543_s7 }
  0x20   : > { %p546_p10 = pnand %p544_p9, %p532_p13  ;;  %p553_p4 = por %p552_p6, %p551_p2 }
  0x22   : > { %p547_p1 = pneg %p546_p10 }
  0x24   : > { %p554_p8 = pnand %p553_p4, %p547_p1 }
  0x26   : > { %557 = shalt.err (!%p554_p8)
}
  0x27   : > { %s661_s8 = smov 256   ;;  %s662_s9 = smov 16  }
  0x28   : > { %477 = dma.hbm_to_vmem [thread:$0]  (!%p737_p11), %s893_s1, 4096, %s730_s22, [#allocation6], %s661_s8, %s661_s8, %s662_s9  }
  0x29   : > { %p25_p2 = scmp.eq.s32.totalorder %s24_s26, 0  ;;  %p34_p1 = scmp.ne.s32.totalorder %s654_s14, %s650_s13 }
  0x2a   : > { %p35_p4 = scmp.eq.s32.totalorder %s658_s15, 0  ;;  %p487_p6 = scmp.lt.s32.totalorder %s658_s15, 2 }
  0x2b   : > { %s773_s17 = scalar_select %p25_p2, %s654_s14, %s27_s25  }
  0x2c   : > { %p36_p8 = por %p35_p4, %p34_p1  ;;  %p903_p10 = scmp.eq.s32.totalorder %s707_s16, 1 }
  0x2d   : > { %s148_s27 = sand.u32 1, %s654_s14   ;;  %s423_s28 = sshll.u32 %s658_s15, 7 }
  0x2e   : > { %p777_p12 = por %p903_p10, %p34_p1  ;;  %s422_s29 = sshll.u32 %s148_s27, 3 }
  0x2f   : > { %s786_s4 = scalar_lea.hbm %s892_s0, %s423_s28  ;;  %s152_s22 = scalar_lea.vmem [#allocation2], %s422_s29 }
  0x30   : > { %s159_s25 = sshll.u32 %s152_s22, 4  ;;  %p788_p11 = pnand %p487_p6, %p36_p8  ;;  %s792_s25 = int_to_ptr.vmem [resolvable:$true] %s159_s25 }
  0x31   : > { %s149_s5 = scalar_lea.sflag [#allocation3], %s148_s27  ;;  %s558_s6 = scalar_lea.hbm %s786_s4, 128 }
  0x32   : > { %p559_p13 = scmp.ne.s32.totalorder %s786_s4, %s558_s6  ;;  %p560_p0 = pneg %p788_p11 }
  0x33   : > { %s563_s9 = scalar_lea.hbm %s892_s0, 256  ;;  %p564_p7 = scmp.lt.u32.totalorder %s786_s4, %s892_s0 }
  0x34   : > { %p561_p3 = pnand %p560_p0, %p559_p13  ;;  %p565_p9 = scmp.lt.u32.totalorder %s563_s9, %s558_s6 }
  0x35   : > { %p567_p1 = scmp.lt.u32.totalorder %s558_s6, %s786_s4 }
  0x36   : > { %p562_p5 = pneg %p561_p3  ;;  %p566_p2 = por %p565_p9, %p564_p7 }
  0x38   : > { %p568_p4 = por %p567_p1, %p566_p2 }
  0x3a   : > { %p569_p6 = pnand %p568_p4, %p562_p5 }
  0x3c   : > { %572 = shalt.err (!%p569_p6)
}
  0x3d   : > { %s573_s27 = scalar_lea.vmem %s792_s25, 128  ;;  %s663_s28 = smov [#allocation2]  }
  0x3e   : > { %p574_p8 = scmp.ne.s32.totalorder %s792_s25, %s573_s27  ;;  %s578_s29 = sshll.u32 %s663_s28, 4  ;;  %s579_s29 = int_to_ptr.vmem [resolvable:$false] %s578_s29 }
  0x3f   : > { %s580_s23 = scalar_lea.vmem %s579_s29, 256  ;;  %p581_p3 = scmp.lt.s32.totalorder %s792_s25, %s579_s29 }
  0x40   : > { %p576_p10 = pnand %p574_p8, %p560_p0  ;;  %p582_p7 = scmp.lt.s32.totalorder %s580_s23, %s573_s27 }
  0x42   : > { %p577_p13 = pneg %p576_p10  ;;  %p583_p9 = por %p582_p7, %p581_p3 }
  0x44   : > { %p584_p2 = pnand %p583_p9, %p577_p13 }
  0x46   : > { %587 = shalt.err (!%p584_p2)
}
  0x47   : > { %481 = dma.hbm_to_vmem [thread:$0]  (!%p788_p11), %s786_s4, 128, %s792_s25, %s149_s5  }
  0x48   : > { %p906_p5 = scmp.ne.s32.totalorder %s901_s20, 0 }
  0x49   : > { %s822_s30 = sand.u32 (!%p906_p5), 1, %s650_s13   ;;  %p907_p0 = scmp.ne.s32.totalorder (!%p906_p5), %s899_s18, 0 }
  0x4a   : > { %168 = sbr.rel (%p906_p5) target bundleno = 379 (0x17b), region = 32  ;;  %s425_s22 = sshll.u32 (!%p906_p5), %s822_s30, 3 }
  0x4b   : > { %s171_s6 = scalar_lea.sflag (!%p906_p5), [#allocation3], %s822_s30  ;;  %s828_s7 = scalar_lea.vmem (!%p906_p5), [#allocation2], %s425_s22 }
  0x51   : > { %633 = dma.done.wait (%p907_p0), %s171_s6, 128  }
  0x52   : > { %635 = vsyncadd (%p907_p0), %s171_s6, 4294967168  ;;  %p908_p11 = scmp.eq.s32.totalorder %s707_s16, 0 }
  0x54   : > { %637 = dma.done.wait (%p908_p11), [#allocation6], 4096   ;;  %p909_p1 = pmov %p908_p11 }
  0x55   : > { %v664_v0 = vmov 0.0   ;;  %v203_v1 = vld [vmem:[#allocation5 + $0x8] sm:$0xff]  ;;  %v205_v2 = vld [vmem:[#allocation5 + $0x18] sm:$0xff]  ;;  %v202_v3 = vld [vmem:[#allocation5] sm:$0xff]  ;;  %s431_s4 = sshll.u32 %s707_s16, 7  ;;  %s200_s25 = scalar_lea.vmem [#allocation7], %s425_s22 }
  0x56   : > { %639 = vsyncadd (%p909_p1), [#allocation6], 4294963200  ;;  %298 = vmatprep.mubr.f32.mxu0 %v664_v0  ;;  %v434_v4 = vpack.c.bf16 %v205_v2, %v203_v1  ;;  %v204_v5 = vld [vmem:[#allocation5 + $0x10] sm:$0xff]  ;;  %v207_v6 = vld [vmem:[#allocation5 + $0x28] sm:$0xff]  ;;  %s338_s26 = sshll.u32 %s200_s25, 4  ;;  %s848_s9 = scalar_lea.hbm %s895_s3, %s431_s4  ;;  %s850_s26 = int_to_ptr.vmem [resolvable:$true] %s338_s26 }
  0x57   : > { %v209_v7 = vld [vmem:[#allocation5 + $0x38] sm:$0xff]  ;;  %v436_v8 = vpack.c.bf16 %v204_v5, %v202_v3  ;;  %v206_v10 = vld [vmem:[#allocation5 + $0x20] sm:$0xff]  ;;  %v208_v11 = vld [vmem:[#allocation5 + $0x30] sm:$0xff]  ;;  %s325_s10 = scalar_lea.sflag [#allocation4], %s822_s30  ;;  %s588_s11 = scalar_lea.vmem %s850_s26, 128 }
  0x58   : > { %v438_v9 = vpack.c.bf16 %v209_v7, %v207_v6  ;;  %v211_v12 = vld [vmem:[#allocation5 + $0x48] sm:$0xff]  ;;  %435 = vmatprep.subr.bf16.mxu0 %v434_v4  ;;  %v213_v13 = vld [vmem:[#allocation5 + $0x58] sm:$0xff]  ;;  %v440_v14 = vpack.c.bf16 %v208_v11, %v206_v10  ;;  %v210_v16 = vld [vmem:[#allocation5 + $0x40] sm:$0xff]  ;;  %p589_p4 = scmp.ne.s32.totalorder %s850_s26, %s588_s11  ;;  %s665_s16 = smov [#allocation7]  }
  0x59   : > { %437 = vmatpush1.bf16.msra.mxu0 %v436_v8  ;;  %v442_v15 = vpack.c.bf16 %v213_v13, %v211_v12  ;;  %v212_v17 = vld [vmem:[#allocation5 + $0x50] sm:$0xff]  ;;  %v215_v18 = vld [vmem:[#allocation5 + $0x68] sm:$0xff]  ;;  %v217_v19 = vld [vmem:[#allocation5 + $0x78] sm:$0xff]  ;;  %s592_s27 = sshll.u32 %s665_s16, 4  ;;  %s593_s27 = int_to_ptr.vmem [resolvable:$false] %s592_s27 }
  0x5a   : > { %439 = vmatprep.subr.bf16.mxu0 %v438_v9  ;;  %v444_v20 = vpack.c.bf16 %v212_v17, %v210_v16  ;;  %v446_v21 = vpack.c.bf16 %v217_v19, %v215_v18  ;;  %v214_v22 = vld [vmem:[#allocation5 + $0x60] sm:$0xff]  ;;  %v216_v23 = vld [vmem:[#allocation5 + $0x70] sm:$0xff]  ;;  %v219_v24 = vld [vmem:[#allocation5 + $0x88] sm:$0xff]  ;;  %p590_p6 = pnand %p589_p4, %p777_p12  ;;  %s594_s28 = scalar_lea.vmem %s593_s27, 256 }
  0x5b   : > { %v221_v25 = vld [vmem:[#allocation5 + $0x98] sm:$0xff]  ;;  %v448_v26 = vpack.c.bf16 %v216_v23, %v214_v22  ;;  %v218_v28 = vld [vmem:[#allocation5 + $0x80] sm:$0xff]  ;;  %v220_v29 = vld [vmem:[#allocation5 + $0x90] sm:$0xff]  ;;  %p595_p10 = scmp.lt.s32.totalorder %s850_s26, %s593_s27  ;;  %p596_p13 = scmp.lt.s32.totalorder %s594_s28, %s588_s11 }
  0x5c   : > { %v450_v27 = vpack.c.bf16 %v221_v25, %v219_v24  ;;  %v223_v30 = vld [vmem:[#allocation5 + $0xa8] sm:$0xff]  ;;  %v225_v31 = vld [vmem:[#allocation5 + $0xb8] sm:$0xff]  ;;  %v452_v32 = vpack.c.bf16 %v220_v29, %v218_v28  ;;  %v222_v34 = vld [vmem:[#allocation5 + $0xa0] sm:$0xff]  ;;  %p591_p8 = pneg %p590_p6 }
  0x5d   : > { %441 = vmatpush1.bf16.msra.mxu0 %v440_v14  ;;  %v454_v33 = vpack.c.bf16 %v225_v31, %v223_v30  ;;  %v224_v35 = vld [vmem:[#allocation5 + $0xb0] sm:$0xff]  ;;  %v227_v36 = vld [vmem:[#allocation5 + $0xc8] sm:$0xff]  ;;  %v229_v37 = vld [vmem:[#allocation5 + $0xd8] sm:$0xff]  ;;  %p597_p3 = por %p596_p13, %p595_p10 }
  0x5e   : > { %443 = vmatprep.subr.bf16.mxu0 %v442_v15  ;;  %v456_v38 = vpack.c.bf16 %v224_v35, %v222_v34  ;;  %v458_v39 = vpack.c.bf16 %v229_v37, %v227_v36  ;;  %v226_v40 = vld [vmem:[#allocation5 + $0xc0] sm:$0xff]  ;;  %v228_v41 = vld [vmem:[#allocation5 + $0xd0] sm:$0xff]  ;;  %v231_v42 = vld [vmem:[#allocation5 + $0xe8] sm:$0xff] }
  0x5f   : > { %v233_v43 = vld [vmem:[#allocation5 + $0xf8] sm:$0xff]  ;;  %v460_v44 = vpack.c.bf16 %v228_v41, %v226_v40  ;;  %v230_v46 = vld [vmem:[#allocation5 + $0xe0] sm:$0xff]  ;;  %v232_v47 = vld [vmem:[#allocation5 + $0xf0] sm:$0xff]  ;;  %p598_p7 = pnand %p597_p3, %p591_p8 }
  0x60   : > { %v462_v45 = vpack.c.bf16 %v233_v43, %v231_v42  ;;  %v464_v48 = vpack.c.bf16 %v232_v47, %v230_v46  ;;  %v201_v49 = vld [vmem:[%s828_s7] sm:$0xff] }
  0x61   : > { %445 = vmatpush1.bf16.msra.mxu0 %v444_v20  ;;  %v428_v50 = vld [vmem:[%s894_s2] ss:$0 sm:$0xff] }
  0x62   : > { %447 = vmatprep.subr.bf16.mxu0 %v446_v21 }
  0x65   : > { %449 = vmatpush1.bf16.msra.mxu0 %v448_v26 }
  0x66   : > { %451 = vmatprep.subr.bf16.mxu0 %v450_v27 }
  0x69   : > { %453 = vmatpush1.bf16.msra.mxu0 %v452_v32 }
  0x6a   : > { %455 = vmatprep.subr.bf16.mxu0 %v454_v33 }
  0x6d   : > { %457 = vmatpush1.bf16.msra.mxu0 %v456_v38 }
  0x6e   : > { %459 = vmatprep.subr.bf16.mxu0 %v458_v39 }
  0x71   : > { %461 = vmatpush1.bf16.msra.mxu0 %v460_v44 }
  0x72   : > { %463 = vmatprep.subr.bf16.mxu0 %v462_v45 }
  0x75   : > { %465 = vmatpush1.bf16.msra.mxu0 %v464_v48 }
  0x78   : > { %299 = vmatmul.mubr.f32.vlgmr.msra.gmra.mrb[0].mxu0 %v201_v49 }
 0x14b   : > { %v300_v51 = vpop.f32.mrb[0].mxu0 }
 0x14c   : > { %v302_v52 = vpop.f32.mrb[1].mxu0  ;;  %v305_v57 = vmax.f32 %v300_v51, 0.0 }
 0x14d   : > { %v313_v53 = vadd.f32 %v428_v50, %v302_v52 }
 0x14e   : > { %v320_v58 = vsub.f32 %v305_v57, %v201_v49 }
 0x14f   : > { %v429_v54 = vmul.f32 -1.442695, %v313_v53 }
 0x151   : > { %526 = vpow2.f32 %v429_v54 }
 0x15b   : > { %v527_v55 = vpop.eup %526 }
 0x15c   : > { %v317_v56 = vadd.f32 1.0, %v527_v55 }
 0x15e   : > { %528 = vrcp.f32 %v317_v56 }
 0x168   : > { %v529_v59 = vpop.eup %528 }
 0x169   : > { %v321_v60 = vmul.f32 %v529_v59, %v320_v58 }
 0x16b   : > { %v322_v61 = vadd.f32 %v321_v60, %v201_v49 }
 0x16d   : > { %323 = vst [vmem:[%s200_s25] sm:$0xff] %v322_v61 }
 0x16e   : > { %601 = shalt.err (!%p598_p7)
}
 0x16f   : > { %s602_s29 = scalar_lea.hbm %s848_s9, 128  ;;  %s606_s22 = scalar_lea.hbm %s895_s3, 256 }
 0x170   : > { %p603_p9 = scmp.ne.s32.totalorder %s848_s9, %s602_s29  ;;  %p607_p0 = scmp.lt.u32.totalorder %s848_s9, %s895_s3 }
 0x171   : > { %p608_p11 = scmp.lt.u32.totalorder %s606_s22, %s602_s29  ;;  %p610_p4 = scmp.lt.u32.totalorder %s602_s29, %s848_s9 }
 0x172   : > { %p604_p2 = pnand %p603_p9, %p777_p12 }
 0x173   : > { %p609_p1 = por %p608_p11, %p607_p0 }
 0x174   : > { %p605_p5 = pneg %p604_p2 }
 0x175   : > { %p611_p6 = por %p610_p4, %p609_p1 }
 0x177   : > { %p612_p8 = pnand %p611_p6, %p605_p5 }
 0x179   : > { %615 = shalt.err (!%p612_p8)
}
 0x17a   : > { %472 = dma.vmem_to_hbm [thread:$0]  (%p777_p12), %s850_s26, 128, %s848_s9, %s325_s10  }
 0x17b PF: > { %s350_s18 = sand.u32 1, %s646_s12   ;;  %p910_p10 = scmp.ne.s32.totalorder %s900_s19, 0 }
 0x17c   : > { %p911_p13 = scmp.ge.s32.totalorder %s658_s15, 2  ;;  %s351_s20 = scalar_lea.sflag [#allocation4], %s350_s18 }
 0x17e   : > { %p483_p3 = pnand %p911_p13, %p910_p10 }
 0x180   : > { %641 = dma.done.wait (!%p483_p3), %s351_s20, 128  }
 0x181   : > { %643 = vsyncadd (!%p483_p3), %s351_s20, 4294967168  ;;  %p17_p7 = scmp.ge.s32.totalorder %s742_s24, 4   ;;  %s912_s12 = smov %s650_s13 }
 0x182   : > { %s913_s13 = smov %s654_s14  ;;  %s914_s14 = smov %s773_s17 }
 0x183   : > { %s915_s15 = smov %s742_s24  ;;  %19 = sbr.rel (!%p17_p7) target bundleno = 6 (0x6), region = 81 }
 0x18a   :  { %356 = vsyncpa [#allocation3], 1 }
 0x18b   :  { %358 = vsyncpa [#allocation3 + $0x1], 1 }
 0x18c   :  { %359 = vsyncpa [#allocation6], 1 }
 0x18d   :  { %360 = vsyncpa [#allocation4], 1 }
 0x18e   :  { %362 = vsyncpa [#allocation4 + $0x1], 1 }

</bundles_post_ra>
